<compile_context>
chip_gen: v7x
topology: tpu7x:2x2x1
jax: 0.10.0
libtpu: 0.0.40
codegen_flags: <defaults>
</compile_context>

<pallas_src>
import math

import numpy as np
import jax
import jax.numpy as jnp
from jax.experimental import pallas as pl
from jax.experimental.pallas import tpu as pltpu

HALF_PI_F32 = np.float32(np.pi / 2.0)


def _get_matr_4_temp_enc(emb_dim: int, mode: int) -> np.ndarray:
    """Port of getMatr4TempEnc: (D/2, D) selection matrix, 1s on column mode+2i."""
    matr = np.zeros((emb_dim // 2, emb_dim), dtype=np.float32)
    col = mode
    for i in range(emb_dim // 2):
        matr[i][col] = 1.0
        col += 2
    return matr


def temporal_enc_kernel(t_ref, sel_ref, omega_ref, shift_ref, o_ref):
    # t_ref:     (tile_r, fold) compact timestamps (fold timestamps per output row)
    # sel_ref:   (fold, W)      exact 0/1 one-hot expansion: sel[j, j*D:(j+1)*D] = 1
    # omega_ref: (1, W)         per-lane frequency
    # shift_ref: (1, W)         per-lane phase (0 on cos lanes, pi/2 on sin lanes)
    # o_ref:     (tile_r, W)    lane-dense output slab
    #
    # Expand timestamps to the lane-dense layout on the otherwise idle MXU.
    # HIGHEST precision keeps the 0/1-selection expansion exact in f32.
    t_exp = jnp.dot(
        t_ref[...], sel_ref[...],
        preferred_element_type=jnp.float32,
        precision=jax.lax.Precision.HIGHEST,
    )
    phi = t_exp * omega_ref[...] - shift_ref[...]      # VPU, (1, W) broadcasts over rows
    o_ref[...] = jnp.cos(phi).astype(o_ref.dtype)      # one EUP transcendental / element


def _pick_tile_rows(R: int, W: int) -> int:
    """~2 MiB output tiles (HBM-roofline sweet spot) but keep >= ~8 grid steps."""
    target_rows = (2 * 1024 * 1024) // (W * 4)
    tile_r = max(16, min(4096, (target_rows // 16) * 16))
    min_steps = 8
    rows_for_min_steps = (R + min_steps - 1) // min_steps
    cap = max(16, ((rows_for_min_steps + 15) // 16) * 16)
    return min(tile_r, cap)


def temporal_encoding(timestamps, omega_t, matr_cos, matr_sin, bias,
                      *, out_dtype=jnp.float32, tile_r=None):
    """timestamps: (B, S) float32; returns (B, S, D) in `out_dtype`.

    NOTE: the single-cos reduction is only valid because matr4Cos/matr4Sin are
    the module's fixed disjoint 0/1 selection matrices and bias is exactly
    [0,1,0,1,...]; omega_t may be arbitrary (trainable) without affecting it.
    """
    B, S = timestamps.shape
    D = matr_cos.shape[1]
    N = B * S

    # Tiny one-time projection in XLA (not re-issued per grid step).
    wc = (omega_t.reshape(1, -1) @ matr_cos).reshape(1, D)
    ws = (omega_t.reshape(1, -1) @ matr_sin).reshape(1, D)
    omega_cols = (wc + ws).astype(jnp.float32)                            # (1, D)
    shift_cols = (bias.reshape(1, D) * HALF_PI_F32).astype(jnp.float32)   # (1, D)

    # Lane-dense fold: pack `fold` timestamps per row so the output last dim is
    # always a multiple of 128 (full-lane, unmasked stores) for any D.
    fold = 128 // math.gcd(D, 128)
    W = fold * D

    R = (N + fold - 1) // fold                     # output slab rows
    if tile_r is None:
        tile_r = _pick_tile_rows(R, W)

    # Compact (R, fold) timestamp layout: the only input HBM traffic is ~N*4 B.
    t_flat = timestamps.reshape(-1).astype(jnp.float32)
    n_pad = R * fold
    if n_pad != N:
        t_flat = jnp.pad(t_flat, (0, n_pad - N))
    t_compact = t_flat.reshape(R, fold)

    sel = jnp.asarray(np.kron(np.eye(fold, dtype=np.float32),
                              np.ones((1, D), dtype=np.float32)))         # (fold, W)
    omega_lane = jnp.tile(omega_cols, (1, fold))                          # (1, W)
    shift_lane = jnp.tile(shift_cols, (1, fold))                          # (1, W)

    out_itemsize = jnp.dtype(out_dtype).itemsize
    cost = pl.CostEstimate(
        flops=4 * N * D,
        transcendentals=N * D,
        bytes_accessed=N * 4 + N * D * out_itemsize,
    )

    out_slab = pl.pallas_call(
        temporal_enc_kernel,
        out_shape=jax.ShapeDtypeStruct((R, W), out_dtype),
        grid=(pl.cdiv(R, tile_r),),
        in_specs=[
            pl.BlockSpec((tile_r, fold), lambda i: (i, 0)),   # compact timestamps
            pl.BlockSpec((fold, W), lambda i: (0, 0)),        # one-hot expansion matrix
            pl.BlockSpec((1, W), lambda i: (0, 0)),           # per-lane omega
            pl.BlockSpec((1, W), lambda i: (0, 0)),           # per-lane phase shift
        ],
        out_specs=pl.BlockSpec((tile_r, W), lambda i: (i, 0)),
        compiler_params=pltpu.CompilerParams(
            dimension_semantics=("parallel",),   # v7x: shard rows over both TCs
        ),
        cost_estimate=cost,
    )(t_compact, sel, omega_lane, shift_lane)

    out_flat = out_slab.reshape(-1)
    if n_pad != N:
        # Only the rare N % fold != 0 case pays this trim copy.
        out_flat = out_flat[: N * D]
    return out_flat.reshape(B, S, D)


def reference(timestamps, omega_t, matr_cos, matr_sin, bias):
    """Direct port of the PyTorch forward (generic formulation)."""
    wc = omega_t.reshape(1, -1) @ matr_cos           # (1, D)
    ws = omega_t.reshape(1, -1) @ matr_sin           # (1, D)
    return (jnp.cos(timestamps[..., None] * wc)
            + jnp.sin(timestamps[..., None] * ws)
            - bias.reshape(1, 1, -1))


if __name__ == "__main__":
    emb_dim = 32     # embDim
    B, S = 2, 8      # batch, sequence length of timestamps

    # Deterministic parameter init (matches the module's __init__ / forward).
    omega_t = jnp.asarray(np.ones((emb_dim // 2,), dtype=np.float32) * 0.4)
    matr_cos = jnp.asarray(_get_matr_4_temp_enc(emb_dim, 0))
    matr_sin = jnp.asarray(_get_matr_4_temp_enc(emb_dim, 1))
    bias = jnp.asarray(
        np.tile(np.array([0.0, 1.0], dtype=np.float32), emb_dim // 2))

    # Deterministic example input timestamps.
    key = jax.random.PRNGKey(0)
    timestamps = jax.random.uniform(key, (B, S), dtype=jnp.float32) * 10.0

    out = jax.block_until_ready(
        temporal_encoding(timestamps, omega_t, matr_cos, matr_sin, bias))
    ref = reference(timestamps, omega_t, matr_cos, matr_sin, bias)
    np.testing.assert_allclose(np.asarray(out), np.asarray(ref), rtol=1e-5, atol=2e-5)

    # Ragged case (N % fold != 0) exercises the pad/trim path.
    t2 = jax.random.uniform(jax.random.PRNGKey(1), (3, 7), dtype=jnp.float32) * 10.0
    out2 = jax.block_until_ready(
        temporal_encoding(t2, omega_t, matr_cos, matr_sin, bias))
    np.testing.assert_allclose(np.asarray(out2),
                               np.asarray(reference(t2, omega_t, matr_cos, matr_sin, bias)),
                               rtol=1e-5, atol=2e-5)

    # Multi-step grid with a ragged last block (pipelining + boundary masking).
    t3 = jax.random.uniform(jax.random.PRNGKey(2), (4, 300), dtype=jnp.float32) * 10.0
    out3 = jax.block_until_ready(
        temporal_encoding(t3, omega_t, matr_cos, matr_sin, bias))
    np.testing.assert_allclose(np.asarray(out3),
                               np.asarray(reference(t3, omega_t, matr_cos, matr_sin, bias)),
                               rtol=1e-5, atol=2e-5)

    # Optional bf16 output path (halves dominant HBM write traffic on v5e/v6e).
    out_bf16 = jax.block_until_ready(
        temporal_encoding(timestamps, omega_t, matr_cos, matr_sin, bias,
                          out_dtype=jnp.bfloat16))
    np.testing.assert_allclose(np.asarray(out_bf16.astype(jnp.float32)),
                               np.asarray(ref), rtol=2e-2, atol=1e-2)

    print("KERNEL_OK")
</pallas_src>

<mosaic_0001>
module attributes {stable_mosaic.version = 11 : i64} {
  func.func @temporal_enc_kernel(%arg0: i32, %arg1: memref<16x4xf32, #tpu.memory_space<vmem>>, %arg2: memref<4x128xf32, #tpu.memory_space<vmem>>, %arg3: memref<1x128xf32, #tpu.memory_space<vmem>>, %arg4: memref<1x128xf32, #tpu.memory_space<vmem>>, %arg5: memref<16x128xf32, #tpu.memory_space<vmem>>) attributes {dimension_semantics = [#tpu.dimension_semantics<parallel>], iteration_bounds = array<i64: 1>, scalar_prefetch = 0 : i64, scratch_operands = 0 : i64, tpu.core_type = #tpu.core_type<tc>, window_params = [{transform_indices = @transform_0, window_bounds = array<i64: 16, 4>}, {pipeline_mode = #tpu.pipeline_mode<synchronous>, transform_indices = @transform_1, window_bounds = array<i64: 4, 128>}, {pipeline_mode = #tpu.pipeline_mode<synchronous>, transform_indices = @transform_2, window_bounds = array<i64: 1, 128>}, {pipeline_mode = #tpu.pipeline_mode<synchronous>, transform_indices = @transform_3, window_bounds = array<i64: 1, 128>}, {transform_indices = @transform_4, window_bounds = array<i64: 16, 128>}]} {
    %c0 = arith.constant 0 : index
    %c0_0 = arith.constant 0 : index
    %0 = vector.load %arg1[%c0, %c0_0] : memref<16x4xf32, #tpu.memory_space<vmem>>, vector<16x4xf32>
    %c0_1 = arith.constant 0 : index
    %c0_2 = arith.constant 0 : index
    %1 = vector.load %arg2[%c0_1, %c0_2] : memref<4x128xf32, #tpu.memory_space<vmem>>, vector<4x128xf32>
    %cst = arith.constant dense<0.000000e+00> : vector<16x128xf32>
    %2 = tpu.matmul %0, %1, %cst {dimension_numbers = #tpu.dot_dimension_numbers<[1], [0], [0], [1], [0, 0, 1, 1], [], []>, precision = #tpu.contract_precision<fp32>} : vector<16x4xf32>, vector<4x128xf32>, vector<16x128xf32> -> vector<16x128xf32>
    %c0_3 = arith.constant 0 : index
    %c0_4 = arith.constant 0 : index
    %3 = vector.load %arg3[%c0_3, %c0_4] : memref<1x128xf32, #tpu.memory_space<vmem>>, vector<1x128xf32>
    %4 = vector.broadcast %3 : vector<1x128xf32> to vector<16x128xf32>
    %5 = arith.mulf %2, %4 : vector<16x128xf32>
    %c0_5 = arith.constant 0 : index
    %c0_6 = arith.constant 0 : index
    %6 = vector.load %arg4[%c0_5, %c0_6] : memref<1x128xf32, #tpu.memory_space<vmem>>, vector<1x128xf32>
    %7 = vector.broadcast %6 : vector<1x128xf32> to vector<16x128xf32>
    %8 = arith.subf %5, %7 : vector<16x128xf32>
    %9 = math.cos %8 : vector<16x128xf32>
    %c0_7 = arith.constant 0 : index
    %c0_8 = arith.constant 0 : index
    %10 = vector.load %arg5[%c0_7, %c0_8] : memref<16x128xf32, #tpu.memory_space<vmem>>, vector<16x128xf32>
    tpu.vector_store %arg5[%c0_7, %c0_8], %9 {strides = array<i32>} : memref<16x128xf32, #tpu.memory_space<vmem>>, vector<16x128xf32>,
    return
  }
  func.func @transform_0(%arg0: i32) -> (i32, i32) {
    %c0_i32 = arith.constant 0 : i32
    %c0_i32_0 = arith.constant 0 : i32
    return %arg0, %c0_i32 : i32, i32
  }
  func.func @transform_1(%arg0: i32) -> (i32, i32) {
    %c0_i32 = arith.constant 0 : i32
    %c0_i32_0 = arith.constant 0 : i32
    %c0_i32_1 = arith.constant 0 : i32
    return %c0_i32, %c0_i32_0 : i32, i32
  }
  func.func @transform_2(%arg0: i32) -> (i32, i32) {
    %c0_i32 = arith.constant 0 : i32
    %c0_i32_0 = arith.constant 0 : i32
    %c0_i32_1 = arith.constant 0 : i32
    return %c0_i32, %c0_i32_0 : i32, i32
  }
  func.func @transform_3(%arg0: i32) -> (i32, i32) {
    %c0_i32 = arith.constant 0 : i32
    %c0_i32_0 = arith.constant 0 : i32
    %c0_i32_1 = arith.constant 0 : i32
    return %c0_i32, %c0_i32_0 : i32, i32
  }
  func.func @transform_4(%arg0: i32) -> (i32, i32) {
    %c0_i32 = arith.constant 0 : i32
    %c0_i32_0 = arith.constant 0 : i32
    return %arg0, %c0_i32 : i32, i32
  }
}

</mosaic_0001>

<bundles_post_ra>
// kernel: tpu_custom_call.1
= control target key start
LH: loop header
LB: loop body
LE: loop exit
PB: predicated region body
PF: predicated region fallthrough
CT: control target
= control target key end

     0   :  { %9 = vsyncpa [#allocation3], 0  ;;  %s1120_s0 = inlined_call_operand.hbm [shape: f32[4,4], index: 0, kind: input, shape index: {}]   ;;  %s1121_s1 = inlined_call_operand.hbm [shape: f32[4,128], index: 1, kind: input, shape index: {}]   ;;  %s1122_s2 = inlined_call_operand.vmem [shape: f32[1,128], index: 2, kind: input, shape index: {}]   ;;  %s1123_s3 = inlined_call_operand.vmem [shape: f32[1,128], index: 3, kind: input, shape index: {}]   ;;  %s1124_s4 = inlined_call_operand.hbm [shape: f32[4,128], index: 4, kind: output, shape index: {}]  }
   0x1   :  { %10 = vsyncpa [#allocation6], 0 }
   0x2   :  { %11 = vsyncpa [#allocation4], 0 }
   0x3   :  { %16 = vsyncadd [#allocation3], 192  ;;  %s958_s15 = smov [#allocation2]   ;;  %s886_s19 = scalar_lea.hbm %s1120_s0, 64 }
   0x4   :  { %s17_s16 = sshll.u32 %s958_s15, 4  ;;  %p887_p0 = scmp.ne.s32.totalorder %s1120_s0, %s886_s19  ;;  %s18_s16 = int_to_ptr.vmem [resolvable:$true] %s17_s16 }
   0x5   :  { %p890_p1 = scmp.lt.u32.totalorder %s886_s19, %s1120_s0 }
   0x7   :  { %p892_p2 = pnand %p890_p1, %p887_p0 }
   0x9   :  { %895 = shalt.err (!%p892_p2)
}
   0xa   :  { %s896_s24 = scalar_lea.vmem %s18_s16, 64  ;;  %s900_s25 = scalar_lea.vmem %s18_s16, 256 }
   0xb   :  { %p897_p3 = scmp.ne.s32.totalorder %s18_s16, %s896_s24  ;;  %p901_p4 = scmp.lt.s32.totalorder %s18_s16, %s18_s16 }
   0xc   :  { %p902_p5 = scmp.lt.s32.totalorder %s900_s25, %s896_s24 }
   0xe   :  { %p903_p6 = por %p902_p5, %p901_p4 }
  0x10   :  { %p904_p7 = pnand %p903_p6, %p897_p3 }
  0x12   :  { %907 = shalt.err (!%p904_p7)
}
  0x13   :  { %s959_s26 = smov 64   ;;  %s960_s27 = smov 4  }
  0x14   :  { %23 = dma.hbm_to_vmem [thread:$0]  %s1120_s0, 64, %s18_s16, [#allocation3], %s959_s26, %s959_s26, %s960_s27  }
  0x15   :  { %s961_s30 = smov [#allocation5]   ;;  %s908_s8 = scalar_lea.hbm %s1121_s1, 64 }
  0x16   :  { %s30_s5 = sshll.u32 %s961_s30, 4  ;;  %p909_p8 = scmp.ne.s32.totalorder %s1121_s1, %s908_s8  ;;  %s31_s5 = int_to_ptr.vmem [resolvable:$true] %s30_s5 }
  0x17   :  { %p912_p9 = scmp.lt.u32.totalorder %s908_s8, %s1121_s1 }
  0x19   :  { %p914_p10 = pnand %p912_p9, %p909_p8 }
  0x1b   :  { %917 = shalt.err (!%p914_p10)
}
  0x1c   :  { %s918_s13 = scalar_lea.vmem %s31_s5, 64  ;;  %p923_p12 = scmp.lt.s32.totalorder %s31_s5, %s31_s5 }
  0x1d   :  { %p919_p11 = scmp.ne.s32.totalorder %s31_s5, %s918_s13  ;;  %p924_p13 = scmp.lt.s32.totalorder %s918_s13, %s918_s13 }
  0x1f   :  { %p925_p0 = por %p924_p13, %p923_p12 }
  0x21   :  { %p926_p1 = pnand %p925_p0, %p919_p11 }
  0x23   :  { %929 = shalt.err (!%p926_p1)
}
  0x24   :  { %33 = dma.hbm_to_vmem [thread:$0]  %s1121_s1, 64, %s31_s5, [#allocation6]  }
  0x25   :  { %952 = dma.done.wait [#allocation3], 256  }
  0x26   :  { %953 = vsyncadd [#allocation3], 4294967040 }
  0x27   :  { %954 = dma.done.wait [#allocation6], 64  }
  0x28   :  { %955 = vsyncadd [#allocation6], 4294967232  ;;  %vm54_vm0 = vcmask 1043456   ;;  %vm47_vm1 = vcmask 31744   ;;  %v46_v0 = vld [vmem:[#allocation5] sm:$0xf] }
  0x29   :  { %v44_v1 = vld [vmem:[#allocation2] sm:$0xff]  ;;  %v45_v2 = vld [vmem:[#allocation2 + $0x8] sm:$0xff]  ;;  %v56_v3 = vsel %vm54_vm0, %v46_v0, 0  ;;  %v962_v53 = vmov 683565275  }
  0x2a   :  { %v49_v4 = vsel %vm47_vm1, %v44_v1, 0  ;;  %v52_v5 = vsel %vm47_vm1, %v45_v2, 0  ;;  %v59_v6 = vand.u32 4294901760, %v56_v3  ;;  %v791_v24 = vld [vmem:[%s1122_s2] ss:$0 sm:$0xff] }
  0x2b   :  { %v124_v7 = vand.u32 4294901760, %v49_v4  ;;  %v134_v8 = vand.u32 4294901760, %v52_v5  ;;  %v792_v27 = vld [vmem:[%s1123_s3] ss:$0 sm:$0xff]  ;;  %v963_v57 = vmov 2475754826  }
  0x2c   :  { %834 = vmatprep.subr.mxu0 %v59_v6  ;;  %819 = vmatprep.subr.mxu1 %v59_v6  ;;  %v146_v11 = vsub.f32 %v56_v3, %v59_v6  ;;  %v964_v59 = vmov 2131351028   ;;  %v965_v61 = vmov 2102212464   ;;  %v966_v63 = vmov 920167782  }
  0x2d   :  { %v125_v9 = vsub.f32 %v49_v4, %v124_v7  ;;  %v135_v10 = vsub.f32 %v52_v5, %v134_v8  ;;  %835 = vmatpush3.msra.mxu0 %v59_v6  ;;  %820 = vmatpush3.msra.mxu1 %v59_v6 }
  0x2e   :  { %v147_v14 = vand.u32 4294901760, %v146_v11 }
  0x2f   :  { %v126_v12 = vand.u32 4294901760, %v125_v9  ;;  %v136_v13 = vand.u32 4294901760, %v135_v10 }
  0x30   :  { %v148_v16 = vsub.f32 %v146_v11, %v147_v14  ;;  %839 = vmatprep.subr.mxu0 %v147_v14 }
  0x31   :  { %836 = vmatprep.mubr.f32.mxu0 %v126_v12  ;;  %v127_v15 = vsub.f32 %v125_v9, %v126_v12  ;;  %v137_v17 = vsub.f32 %v135_v10, %v136_v13 }
  0x32   :  { %837 = vmatmul.mubr.f32.vlgmr.msra.gmra.mrb[0].mxu0 %v136_v13  ;;  %v149_v19 = vand.u32 4294901760, %v148_v16 }
  0x33   :  { %v128_v18 = vand.u32 4294901760, %v127_v15  ;;  %v138_v20 = vand.u32 4294901760, %v137_v17  ;;  %840 = vmatpush3.msra.mxu0 %v147_v14  ;;  %841 = vmatprep.mubr.f32.mxu0 %v124_v7 }
  0x34   :  { %844 = vmatprep.subr.mxu0 %v59_v6  ;;  %824 = vmatprep.subr.mxu1 %v149_v19 }
  0x35   :  { %821 = vmatprep.mubr.f32.mxu1 %v128_v18 }
  0x36   :  { %822 = vmatmul.mubr.f32.vlgmr.msra.gmra.mrb[0].mxu1 %v138_v20 }
  0x37   :  { %825 = vmatpush3.msra.mxu1 %v149_v19  ;;  %826 = vmatprep.mubr.f32.mxu1 %v124_v7 }
  0x38   :  { %829 = vmatprep.subr.mxu1 %v146_v11 }
  0x3a   :  { %842 = vmatmul.mubr.f32.vlgmr.msra.gmra.mrb[0].mxu0 %v134_v8 }
  0x3b   :  { %845 = vmatpush3.msra.mxu0 %v59_v6  ;;  %846 = vmatprep.mubr.f32.mxu0 %v124_v7  ;;  %v967_v6 = vmov 1326507024  }
  0x3e   :  { %827 = vmatmul.mubr.f32.vlgmr.msra.gmra.mrb[0].mxu1 %v134_v8 }
  0x3f   :  { %830 = vmatpush3.msra.mxu1 %v146_v11  ;;  %831 = vmatprep.mubr.f32.mxu1 %v125_v9 }
  0x42   :  { %847 = vmatmul.mubr.f32.vlgmr.msra.gmra.mrb[0].mxu0 %v134_v8 }
  0x46   :  { %832 = vmatmul.mubr.f32.vlgmr.msra.gmra.mrb[0].mxu1 %v135_v10 }
 0x115   :  { %v848_v21 = vpop.f32.mrb[0].mxu0 }
 0x116   :  { %v537_v22 = vpop.f32.mrb[1].mxu0 }
 0x119   :  { %v833_v23 = vpop.f32.mrb[0].mxu1 }
 0x11a   :  { %v849_v25 = vadd.f32 %v848_v21, %v833_v23  ;;  %v296_v26 = vpop.f32.mrb[1].mxu1 }
 0x11b   :  { %v850_v28 = vadd.f32 %v537_v22, %v296_v26 }
 0x11c   :  { %v555_v29 = vmul.f32 %v849_v25, %v791_v24 }
 0x11d   :  { %v554_v30 = vmul.f32 %v850_v28, %v791_v24 }
 0x11e   :  { %v1027_v31 = vsub.f32 %v555_v29, %v792_v27 }
 0x11f   :  { %v1029_v32 = vsub.f32 %v554_v30, %v792_v27 }
 0x120   :  { %v668_v33 = vand.u32 2147483647, %v1027_v31  ;;  %v671_v34 = vand.u32 2139095040, %v1027_v31  ;;  %vm670_vm0 = vcmp.lt.s32.totalorder %v1027_v31, 0 }
 0x121   :  { %v568_v35 = vand.u32 2139095040, %v1029_v32  ;;  %v565_v38 = vand.u32 2147483647, %v1029_v32 }
 0x122   :  { %v672_v36 = vshrl.u32 %v671_v34, 23  ;;  %v675_v37 = vand.u32 8388607, %v668_v33  ;;  %vm1082_vm1 = vcmp.le.f32.partialorder %v668_v33, 0.7853982 }
 0x123   :  { %v569_v39 = vshrl.u32 %v568_v35, 23  ;;  %v1039_v44 = vand.u32 8388607, %v565_v38 }
 0x124   :  { %v797_v40 = vadd.s32 4294967169, %v672_v36  ;;  %v676_v43 = vor.u32 8388608, %v675_v37 }
 0x125   :  { %v793_v41 = vadd.s32 4294967169, %v569_v39  ;;  %v573_v51 = vor.u32 8388608, %v1039_v44 }
 0x126   :  { %v678_v42 = vadd.s32 1, %v797_v40  ;;  %v1041_v50 = vshll.u32 %v676_v43, 8 }
 0x127   :  { %v575_v45 = vadd.s32 1, %v793_v41 }
 0x128   :  { %vm679_vm2 = vcmp.gt.s32.totalorder %v678_v42, 0 }
 0x129   :  { %v680_v46 = vsel %vm679_vm2, %v678_v42, 0  ;;  %vm576_vm3 = vcmp.gt.s32.totalorder %v575_v45, 0  ;;  %vm567_vm2 = vcmp.lt.s32.totalorder %v1029_v32, 0 }
 0x12a   :  { %v681_v47 = vshrl.u32 %v680_v46, 5  ;;  %v682_v48 = vand.u32 31, %v680_v46  ;;  %v577_v49 = vsel %vm576_vm3, %v575_v45, 0  ;;  %v613_v45 = vshll.u32 %v573_v51, 8 }
 0x12b   :  { %v1044_v55 = vshrl.u32 %v577_v49, 5  ;;  %v579_v56 = vand.u32 31, %v577_v49  ;;  %vm1094_vm3 = vcmp.le.f32.partialorder %v565_v38, 0.7853982 }
 0x12c   :  { %v683_v52 = vsub.s32 32, %v682_v48  ;;  %v685_v54 = vshll.u32 %v962_v53, %v682_v48  ;;  %v688_v58 = vshll.u32 %v963_v57, %v682_v48  ;;  %v691_v60 = vshll.u32 %v964_v59, %v682_v48 }
 0x12d   :  { %v694_v62 = vshll.u32 %v965_v61, %v682_v48  ;;  %v697_v0 = vshll.u32 %v966_v63, %v682_v48  ;;  %vm700_vm4 = vcmp.lt.s32.totalorder %v681_v47, 1  ;;  %vm701_vm5 = vcmp.lt.s32.totalorder %v681_v47, 2 }
 0x12e   :  { %v686_v1 = vshrl.u32 %v963_v57, %v683_v52  ;;  %v689_v2 = vshrl.u32 %v964_v59, %v683_v52  ;;  %v692_v3 = vshrl.u32 %v965_v61, %v683_v52  ;;  %v684_v4 = vshrl.u32 %v962_v53, %v683_v52 }
 0x12f   :  { %v695_v5 = vshrl.u32 %v966_v63, %v683_v52  ;;  %v698_v7 = vshrl.u32 %v967_v6, %v683_v52  ;;  %v580_v11 = vsub.s32 32, %v579_v56  ;;  %vm702_vm6 = vcmp.lt.s32.totalorder %v681_v47, 3 }
 0x130   :  { %v687_v8 = vor.u32 %v686_v1, %v685_v54  ;;  %v690_v9 = vor.u32 %v689_v2, %v688_v58  ;;  %v693_v10 = vor.u32 %v692_v3, %v691_v60  ;;  %vm703_vm7 = vcmp.lt.s32.totalorder %v681_v47, 4 }
 0x131   :  { %v696_v12 = vor.u32 %v695_v5, %v694_v62  ;;  %v699_v13 = vor.u32 %v698_v7, %v697_v0  ;;  %v582_v21 = vshll.u32 %v962_v53, %v579_v56  ;;  %v583_v24 = vshrl.u32 %v963_v57, %v580_v11 }
 0x132   :  { %v704_v14 = vsel %vm700_vm4, %v684_v4, %v687_v8  ;;  %v705_v15 = vsel %vm703_vm7, %v693_v10, 2102212464  ;;  %v708_v16 = vsel %vm700_vm4, %v687_v8, %v690_v9  ;;  %v712_v17 = vsel %vm700_vm4, %v690_v9, %v693_v10 }
 0x133   :  { %v706_v18 = vsel %vm702_vm6, %v690_v9, %v705_v15  ;;  %v709_v19 = vsel %vm703_vm7, %v696_v12, 920167782  ;;  %v713_v20 = vsel %vm703_vm7, %v699_v13, 1326507024  ;;  %v585_v25 = vshll.u32 %v963_v57, %v579_v56 }
 0x134   :  { %v710_v22 = vsel %vm702_vm6, %v693_v10, %v709_v19  ;;  %v714_v23 = vsel %vm702_vm6, %v696_v12, %v713_v20  ;;  %v707_v26 = vsel %vm701_vm5, %v704_v14, %v706_v18  ;;  %v586_v29 = vshrl.u32 %v964_v59, %v580_v11 }
 0x135   :  { %v711_v27 = vsel %vm701_vm5, %v708_v16, %v710_v22  ;;  %v715_v28 = vsel %vm701_vm5, %v712_v17, %v714_v23  ;;  %v584_v37 = vor.u32 %v583_v24, %v582_v21  ;;  %v588_v40 = vshll.u32 %v964_v59, %v579_v56 }
 0x136   :  { %v1053_v30 = vmul.u32.u64.low %v1041_v50, %v715_v28  ;;  %v1054_v34 = vmul.u32.u64.high %v1041_v50, %v715_v28, %v1053_v30  ;;  %v1057_v35 = vmul.u32.u64.low %v1041_v50, %v711_v27  ;;  %v1058_v36 = vmul.u32.u64.high %v1041_v50, %v711_v27, %v1057_v35 }
 0x137   :  { %v587_v39 = vor.u32 %v586_v29, %v585_v25  ;;  %v589_v41 = vshrl.u32 %v965_v61, %v580_v11  ;;  %v591_v42 = vshll.u32 %v965_v61, %v579_v56  ;;  %v592_v43 = vshrl.u32 %v966_v63, %v580_v11 }
 0x138   :  { %v595_v44 = vshrl.u32 %v967_v6, %v580_v11  ;;  %v723_v46 = vmul.u32 %v1041_v50, %v707_v26  ;;  %v581_v47 = vshrl.u32 %v962_v53, %v580_v11  ;;  %v594_v49 = vshll.u32 %v966_v63, %v579_v56 }
 0x139   :  { %v590_v48 = vor.u32 %v589_v41, %v588_v40  ;;  %vm725_vm8 = vc.u32 %v1054_v34, %v1057_v35  ;;  %v726_v52 = vadd.s32 1, %v1058_v36  ;;  %v593_v54 = vor.u32 %v592_v43, %v591_v42 }
 0x13a   :  { %vm597_vm9 = vcmp.lt.s32.totalorder %v1044_v55, 1  ;;  %v596_v57 = vor.u32 %v595_v44, %v594_v49  ;;  %vm599_vm10 = vcmp.lt.s32.totalorder %v1044_v55, 3  ;;  %vm600_vm11 = vcmp.lt.s32.totalorder %v1044_v55, 4 }
 0x13b   :  { %v605_v58 = vsel %vm597_vm9, %v584_v37, %v587_v39  ;;  %v727_v51 = vsel %vm725_vm8, %v726_v52, %v1058_v36  ;;  %v602_v59 = vsel %vm600_vm11, %v590_v48, 2102212464  ;;  %v606_v50 = vsel %vm600_vm11, %v593_v54, 920167782 }
 0x13c   :  { %v609_v53 = vsel %vm597_vm9, %v587_v39, %v590_v48  ;;  %v728_v60 = vadd.s32 %v727_v51, %v723_v46  ;;  %vm598_vm12 = vcmp.lt.s32.totalorder %v1044_v55, 2  ;;  %v607_v56 = vsel %vm599_vm10, %v590_v48, %v606_v50 }
 0x13d   :  { %v610_v61 = vsel %vm600_vm11, %v596_v57, 1326507024  ;;  %v601_v62 = vsel %vm597_vm9, %v581_v47, %v584_v37  ;;  %v603_v63 = vsel %vm599_vm10, %v587_v39, %v602_v59  ;;  %v608_v0 = vsel %vm598_vm12, %v605_v58, %v607_v56 }
 0x13e   :  { %v611_v1 = vsel %vm599_vm10, %v593_v54, %v610_v61  ;;  %v729_v2 = vadd.s32 536870912, %v728_v60  ;;  %v1068_v4 = vmul.u32.u64.low %v613_v45, %v608_v0  ;;  %v1069_v5 = vmul.u32.u64.high %v613_v45, %v608_v0, %v1068_v4 }
 0x13f   :  { %v612_v3 = vsel %vm598_vm12, %v609_v53, %v611_v1  ;;  %v604_v9 = vsel %vm598_vm12, %v601_v62, %v603_v63  ;;  %v724_v25 = vadd.s32 %v1057_v35, %v1054_v34  ;;  %vm760_vm7 = vweird.f32 %v1027_v31 }
 0x140   :  { %v1071_v6 = vmul.u32.u64.low %v613_v45, %v612_v3  ;;  %v1072_v7 = vmul.u32.u64.high %v613_v45, %v612_v3, %v1071_v6  ;;  %v730_v8 = vshrl.u32 %v729_v2, 30  ;;  %v623_v11 = vadd.s32 1, %v1069_v5 }
 0x141   :  { %v620_v55 = vmul.u32 %v613_v45, %v604_v9  ;;  %vm657_vm11 = vweird.f32 %v1029_v32 }
 0x142   :  { %v731_v10 = vshll.u32 %v730_v8, 30  ;;  %vm622_vm13 = vc.u32 %v1072_v7, %v1068_v4  ;;  %v621_v46 = vadd.s32 %v1068_v4, %v1072_v7  ;;  %v754_v50 = vsub.s32 4, %v730_v8 }
 0x143   :  { %v624_v13 = vsel %vm622_vm13, %v623_v11, %v1069_v5 }
 0x144   :  { %v732_v12 = vsub.s32 %v728_v60, %v731_v10  ;;  %v625_v14 = vadd.s32 %v624_v13, %v620_v55  ;;  %v755_v62 = vsel %vm670_vm0, %v754_v50, %v730_v8 }
 0x145   :  { %v757_v0 = vsel %vm1082_vm1, 0, %v755_v62 }
 0x146   :  { %v734_v15 = vsub.s32 0, %v732_v12  ;;  %v626_v16 = vadd.s32 536870912, %v625_v14  ;;  %v761_v4 = vand.u32 3, %v757_v0 }
 0x148   :  { %v798_v17 = vmin.u32 %v734_v15, %v732_v12  ;;  %v627_v18 = vshrl.u32 %v626_v16, 30  ;;  %vm766_vm4 = vcmp.eq.s32.totalorder %v761_v4, 2  ;;  %vm763_vm5 = vcmp.eq.s32.totalorder %v761_v4, 0 }
 0x149   :  { %vm762_vm6 = vcmp.lt.s32.totalorder %v761_v4, 2 }
 0x14a   :  { %v736_v19 = vclz %v798_v17  ;;  %v628_v20 = vshll.u32 %v627_v18, 30  ;;  %v651_v3 = vsub.s32 4, %v627_v18 }
 0x14c   :  { %v799_v21 = vadd.s32 4294967294, %v736_v19  ;;  %v629_v22 = vsub.s32 %v625_v14, %v628_v20  ;;  %v652_v9 = vsel %vm567_vm2, %v651_v3, %v627_v18 }
 0x14d   :  { %v654_v55 = vsel %vm1094_vm3, 0, %v652_v9 }
 0x14e   :  { %vm800_vm14 = vcmp.lt.s32.totalorder %v799_v21, 0  ;;  %v631_v24 = vsub.s32 0, %v629_v22  ;;  %v658_v14 = vand.u32 3, %v654_v55 }
 0x14f   :  { %v739_v23 = vsel %vm800_vm14, 0, %v799_v21 }
 0x150   :  { %v740_v26 = vsub.s32 32, %v739_v23  ;;  %v744_v27 = vsub.s32 4294967266, %v739_v23  ;;  %v794_v28 = vmin.u32 %v631_v24, %v629_v22  ;;  %v741_v29 = vshll.u32 %v732_v12, %v739_v23 }
 0x151   :  { %vm663_vm8 = vcmp.eq.s32.totalorder %v658_v14, 2  ;;  %vm660_vm9 = vcmp.eq.s32.totalorder %v658_v14, 0  ;;  %vm659_vm10 = vcmp.lt.s32.totalorder %v658_v14, 2 }
 0x152   :  { %v742_v30 = vshrl.u32 %v724_v25, %v740_v26  ;;  %v745_v36 = vadd.s32 127, %v744_v27  ;;  %v633_v37 = vclz %v794_v28 }
 0x154   :  { %v743_v39 = vor.u32 %v742_v30, %v741_v29  ;;  %v746_v40 = vshll.u32 %v745_v36, 23  ;;  %v795_v41 = vadd.s32 4294967294, %v633_v37 }
 0x156   :  { %v747_v42 = vor.u32 4788187, %v746_v40  ;;  %vm796_vm15 = vcmp.lt.s32.totalorder %v795_v41, 0  ;;  %v750_v44 = vcvt.s32.f32 %v743_v39 }
 0x157   :  { %v636_v45 = vsel %vm796_vm15, 0, %v795_v41 }
 0x158   :  { %v748_v43 = vand.u32 2147483647, %v747_v42  ;;  %v637_v47 = vsub.s32 32, %v636_v45  ;;  %v641_v48 = vsub.s32 4294967266, %v636_v45  ;;  %v638_v35 = vshll.u32 %v629_v22, %v636_v45 }
 0x15a   :  { %v751_v34 = vmul.f32 %v750_v44, %v748_v43  ;;  %v639_v49 = vshrl.u32 %v621_v46, %v637_v47  ;;  %v642_v52 = vadd.s32 127, %v641_v48 }
 0x15c   :  { %v752_v54 = vxor.u32 2147483648, %v751_v34  ;;  %v640_v57 = vor.u32 %v639_v49, %v638_v35  ;;  %v643_v58 = vshll.u32 %v642_v52, 23 }
 0x15e   :  { %v753_v59 = vsel %vm670_vm0, %v752_v54, %v751_v34  ;;  %v644_v60 = vor.u32 4788187, %v643_v58  ;;  %v647_v61 = vcvt.s32.f32 %v640_v57 }
 0x15f   :  { %v756_v53 = vsel %vm1082_vm1, %v1027_v31, %v753_v59 }
 0x160   :  { %878 = vcosq.f32 %v756_v53  ;;  %v645_v56 = vand.u32 2147483647, %v644_v60 }
 0x161   :  { %880 = vsinq.f32 %v756_v53 }
 0x162   :  { %v648_v63 = vmul.f32 %v647_v61, %v645_v56 }
 0x164   :  { %v649_v33 = vxor.u32 2147483648, %v648_v63 }
 0x166   :  { %v650_v2 = vsel %vm567_vm2, %v649_v33, %v648_v63 }
 0x167   :  { %v653_v5 = vsel %vm1094_vm3, %v1029_v32, %v650_v2 }
 0x168   :  { %882 = vcosq.f32 %v653_v5 }
 0x169   :  { %884 = vsinq.f32 %v653_v5 }
 0x16a   :  { %v879_v6 = vpop.eup %878 }
 0x16b   :  { %v881_v7 = vpop.eup %880  ;;  %v767_v8 = vxor.u32 2147483648, %v879_v6 }
 0x16c   :  { %v764_v10 = vxor.u32 2147483648, %v881_v7 }
 0x16d   :  { %v768_v38 = vsel %vm766_vm4, %v767_v8, %v881_v7 }
 0x16e   :  { %v765_v11 = vsel %vm763_vm5, %v879_v6, %v764_v10 }
 0x16f   :  { %v769_v12 = vsel %vm762_vm6, %v765_v11, %v768_v38 }
 0x170   :  { %v770_v13 = vsel %vm760_vm7, nan, %v769_v12 }
 0x171   :  { %772 = vst [vmem:[#allocation7 + $0x8] sm:$0xff] %v770_v13 }
 0x172   :  { %v883_v15 = vpop.eup %882 }
 0x173   :  { %v885_v16 = vpop.eup %884  ;;  %v664_v17 = vxor.u32 2147483648, %v883_v15 }
 0x174   :  { %v661_v19 = vxor.u32 2147483648, %v885_v16 }
 0x175   :  { %v665_v18 = vsel %vm663_vm8, %v664_v17, %v885_v16 }
 0x176   :  { %v662_v20 = vsel %vm660_vm9, %v883_v15, %v661_v19 }
 0x177   :  { %v666_v21 = vsel %vm659_vm10, %v662_v20, %v665_v18 }
 0x178   :  { %v667_v22 = vsel %vm657_vm11, nan, %v666_v21 }
 0x179   :  { %771 = vst [vmem:[#allocation7] sm:$0xff] %v667_v22 }
 0x17a   :  { %777 = vsyncadd [#allocation4], 192  ;;  %s968_s2 = smov [#allocation7]  }
 0x17b   :  { %s778_s3 = sshll.u32 %s968_s2, 4  ;;  %s779_s3 = int_to_ptr.vmem [resolvable:$true] %s778_s3 }
 0x17c   :  { %s930_s18 = scalar_lea.vmem %s779_s3, 64  ;;  %s934_s19 = scalar_lea.vmem %s779_s3, 256 }
 0x17d   :  { %p931_p2 = scmp.ne.s32.totalorder %s779_s3, %s930_s18  ;;  %p935_p3 = scmp.lt.s32.totalorder %s779_s3, %s779_s3 }
 0x17e   :  { %p936_p4 = scmp.lt.s32.totalorder %s934_s19, %s930_s18 }
 0x180   :  { %p937_p5 = por %p936_p4, %p935_p3 }
 0x182   :  { %p938_p6 = pnand %p937_p5, %p931_p2 }
 0x184   :  { %941 = shalt.err (!%p938_p6)
}
 0x185   :  { %s942_s22 = scalar_lea.hbm %s1124_s4, 64 }
 0x186   :  { %p943_p7 = scmp.ne.s32.totalorder %s1124_s4, %s942_s22  ;;  %p946_p8 = scmp.lt.u32.totalorder %s942_s22, %s1124_s4 }
 0x188   :  { %p948_p9 = pnand %p946_p8, %p943_p7 }
 0x18a   :  { %951 = shalt.err (!%p948_p9)
}
 0x18b   :  { %784 = dma.vmem_to_hbm [thread:$0]  %s779_s3, 64, %s1124_s4, [#allocation4], %s959_s26, %s959_s26, %s960_s27  }
 0x18c   :  { %956 = dma.done.wait [#allocation4], 256  }
 0x18d   :  { %957 = vsyncadd [#allocation4], 4294967040 }
 0x18e   :  { %788 = vsyncpa [#allocation3], 1 }
 0x18f   :  { %789 = vsyncpa [#allocation6], 1 }
 0x190   :  { %790 = vsyncpa [#allocation4], 1 }

</bundles_post_ra>
